<compile_context>
chip_gen: v7x
topology: tpu7x:2x2x1
jax: 0.10.0
libtpu: 0.0.40
codegen_flags: <defaults>
</compile_context>

<pallas_src>
import functools
import math

import jax
import jax.numpy as jnp
from jax.experimental import pallas as pl
from jax.experimental.pallas import tpu as pltpu


def _choose_group_size(nb, bd, bs, itemsize, vmem_budget_bytes=8 * 1024 * 1024):
    """Largest G dividing nb s.t. G*bd is lane-dense (mult of 128) and the
    double-buffered tiles fit a conservative VMEM budget.  Falls back to
    G = nb (block == full array, always legal per the (8,128) rule)."""
    best = None
    for g in range(1, nb + 1):
        if nb % g != 0:
            continue
        if (g * bd) % 128 != 0:
            continue
        tile_bytes = 2 * itemsize * (2 * bs * g * bd + g * bd * bd)
        if tile_bytes <= vmem_budget_bytes:
            best = g
    return best if best is not None else nb


def _block_weight_kernel(x_ref, w_ref, o_ref, *, bs, g, bd):
    # x_ref: (bs, g*bd)  lane-dense slab of g consecutive feature blocks
    # w_ref: (g, bd, bd) weights for those g blocks
    # o_ref: (bs, g*bd)  lane-dense output slab
    x = x_ref[...].reshape(bs, g, bd)
    out = jnp.einsum(
        "bgi,gij->bgj", x, w_ref[...], preferred_element_type=jnp.float32
    )
    o_ref[...] = out.reshape(bs, g * bd).astype(o_ref.dtype)


def block_weight_forward(x, weight, block_dim):
    """x: (bs, input_dim); weight: (nb, block_dim, block_dim)."""
    bs, input_dim = x.shape
    assert input_dim % block_dim == 0
    nb = input_dim // block_dim
    assert weight.shape == (nb, block_dim, block_dim)

    itemsize = jnp.dtype(x.dtype).itemsize
    G = _choose_group_size(nb, block_dim, bs, itemsize)
    ngroups = nb // G
    gd = G * block_dim  # lanes per group slab

    kernel = functools.partial(_block_weight_kernel, bs=bs, g=G, bd=block_dim)

    return pl.pallas_call(
        kernel,
        out_shape=jax.ShapeDtypeStruct((bs, input_dim), x.dtype),
        grid_spec=pltpu.PrefetchScalarGridSpec(
            num_scalar_prefetch=0,
            grid=(ngroups,),
            in_specs=[
                # x / out in natural (bs, input_dim) layout, lane-dense slabs.
                pl.BlockSpec((bs, gd), lambda i: (0, i)),
                # weight indexed only by the group axis: each tile DMA'd once.
                pl.BlockSpec((G, block_dim, block_dim), lambda i: (i, 0, 0)),
            ],
            out_specs=pl.BlockSpec((bs, gd), lambda i: (0, i)),
        ),
        compiler_params=pltpu.CompilerParams(
            dimension_semantics=("parallel",),
        ),
    )(x, weight)


def init_block_weight(key, input_dim, block_dim):
    """Deterministic kaiming_uniform_(a=sqrt(5)) equivalent for (nb, bd, bd)."""
    nb = input_dim // block_dim
    fan_in = block_dim * block_dim  # torch fan_in for 3D param: size(1)*prod(size(2:))
    gain = math.sqrt(2.0 / (1.0 + 5.0))  # a = sqrt(5)
    bound = gain * math.sqrt(3.0 / fan_in)
    return jax.random.uniform(
        key, (nb, block_dim, block_dim), jnp.float32, minval=-bound, maxval=bound
    )


def block_weight_reference(x, weight, block_dim):
    bs, input_dim = x.shape
    nb = input_dim // block_dim
    xb = x.reshape(bs, nb, block_dim).transpose(1, 0, 2)  # (nb, bs, bd)
    ob = jnp.einsum("gbi,gij->gbj", xb, weight)           # bmm
    return ob.transpose(1, 0, 2).reshape(bs, input_dim)


if __name__ == "__main__":
    key = jax.random.PRNGKey(0)
    k_w, k_x = jax.random.split(key)

    batch = 8
    block_dim = 32
    input_dim = 128  # num_blocks = 4

    weight = init_block_weight(k_w, input_dim, block_dim)
    x = jax.random.normal(k_x, (batch, input_dim), dtype=jnp.float32)

    out = block_weight_forward(x, weight, block_dim)
    out = jax.block_until_ready(out)

    ref = block_weight_reference(x, weight, block_dim)
    assert out.shape == (batch, input_dim)
    assert jnp.allclose(out, ref, atol=1e-5, rtol=1e-5)

    print("KERNEL_OK")
</pallas_src>

<mosaic_0001>
module attributes {stable_mosaic.version = 11 : i64} {
  func.func @_block_weight_kernel(%arg0: i32, %arg1: memref<8x128xf32, #tpu.memory_space<vmem>>, %arg2: memref<4x32x32xf32, #tpu.memory_space<vmem>>, %arg3: memref<8x128xf32, #tpu.memory_space<vmem>>) attributes {dimension_semantics = [#tpu.dimension_semantics<parallel>], iteration_bounds = array<i64: 1>, scalar_prefetch = 0 : i64, scratch_operands = 0 : i64, tpu.core_type = #tpu.core_type<tc>, window_params = [{transform_indices = @transform_0, window_bounds = array<i64: 8, 128>}, {transform_indices = @transform_1, window_bounds = array<i64: 4, 32, 32>}, {transform_indices = @transform_2, window_bounds = array<i64: 8, 128>}]} {
    %c0 = arith.constant 0 : index
    %c0_0 = arith.constant 0 : index
    %0 = vector.load %arg1[%c0, %c0_0] : memref<8x128xf32, #tpu.memory_space<vmem>>, vector<8x128xf32>
    %1 = vector.shape_cast %0 : vector<8x128xf32> to vector<8x4x32xf32>
    %c0_1 = arith.constant 0 : index
    %c0_2 = arith.constant 0 : index
    %c0_3 = arith.constant 0 : index
    %2 = vector.load %arg2[%c0_1, %c0_2, %c0_3] : memref<4x32x32xf32, #tpu.memory_space<vmem>>, vector<4x32x32xf32>
    "tpu.trace_start"() <{level = 10 : i32, message = "bgi,gij->bgj"}> : () -> ()
    %cst = arith.constant dense<0.000000e+00> : vector<4x32x8xf32>
    %3 = tpu.matmul %2, %1, %cst {dimension_numbers = #tpu.dot_dimension_numbers<[1], [2], [2], [0], [0, 0, 0, 2, 1, 0], [0], [1]>} : vector<4x32x32xf32>, vector<8x4x32xf32>, vector<4x32x8xf32> -> vector<4x32x8xf32>
    %4 = tpu.transpose %3, [2, 0, 1] : vector<4x32x8xf32> -> vector<8x4x32xf32>
    "tpu.trace_stop"() : () -> ()
    %5 = vector.shape_cast %4 : vector<8x4x32xf32> to vector<8x128xf32>
    %c0_4 = arith.constant 0 : index
    %c0_5 = arith.constant 0 : index
    %6 = vector.load %arg3[%c0_4, %c0_5] : memref<8x128xf32, #tpu.memory_space<vmem>>, vector<8x128xf32>
    tpu.vector_store %arg3[%c0_4, %c0_5], %5 {strides = array<i32>} : memref<8x128xf32, #tpu.memory_space<vmem>>, vector<8x128xf32>,
    return
  }
  func.func @transform_0(%arg0: i32) -> (i32, i32) {
    %c0_i32 = arith.constant 0 : i32
    %c0_i32_0 = arith.constant 0 : i32
    return %c0_i32, %arg0 : i32, i32
  }
  func.func @transform_1(%arg0: i32) -> (i32, i32, i32) {
    %c0_i32 = arith.constant 0 : i32
    %c0_i32_0 = arith.constant 0 : i32
    %c0_i32_1 = arith.constant 0 : i32
    return %arg0, %c0_i32, %c0_i32_0 : i32, i32, i32
  }
  func.func @transform_2(%arg0: i32) -> (i32, i32) {
    %c0_i32 = arith.constant 0 : i32
    %c0_i32_0 = arith.constant 0 : i32
    return %c0_i32, %arg0 : i32, i32
  }
}

</mosaic_0001>

<bundles_post_ra>
// kernel: tpu_custom_call.1
= control target key start
LH: loop header
LB: loop body
LE: loop exit
PB: predicated region body
PF: predicated region fallthrough
CT: control target
= control target key end

     0   :  { %7 = vsyncpa [#allocation3], 0  ;;  %s1364_s0 = inlined_call_operand.hbm [shape: f32[8,128], index: 0, kind: input, shape index: {}]   ;;  %s1365_s1 = inlined_call_operand.hbm [shape: f32[4,32,32], index: 1, kind: input, shape index: {}]   ;;  %s1366_s2 = inlined_call_operand.hbm [shape: f32[8,128], index: 2, kind: output, shape index: {}]  }
   0x1   :  { %8 = vsyncpa [#allocation6], 0 }
   0x2   :  { %9 = vsyncpa [#allocation4], 0  ;;  %s1273_s9 = smov [#allocation2]   ;;  %s1274_s11 = smov [#allocation5]  }
   0x3   :  { %s16_s10 = sshll.u32 %s1273_s9, 4  ;;  %s25_s12 = sshll.u32 %s1274_s11, 4  ;;  %s17_s10 = int_to_ptr.vmem [resolvable:$true] %s16_s10  ;;  %s1298_s12 = int_to_ptr.vmem [resolvable:$true] %s25_s12 }
   0x4   :  { %s1201_s15 = scalar_lea.hbm %s1364_s0, 128 }
   0x5   :  { %p1202_p0 = scmp.ne.s32.totalorder %s1364_s0, %s1201_s15  ;;  %p1205_p1 = scmp.lt.u32.totalorder %s1201_s15, %s1364_s0 }
   0x7   :  { %p1207_p2 = pnand %p1205_p1, %p1202_p0 }
   0x9   :  { %1210 = shalt.err (!%p1207_p2)
}
   0xa   :  { %s1211_s20 = scalar_lea.vmem %s17_s10, 128  ;;  %p1216_p4 = scmp.lt.s32.totalorder %s17_s10, %s17_s10 }
   0xb   :  { %p1212_p3 = scmp.ne.s32.totalorder %s17_s10, %s1211_s20  ;;  %p1217_p5 = scmp.lt.s32.totalorder %s1211_s20, %s1211_s20 }
   0xd   :  { %p1218_p6 = por %p1217_p5, %p1216_p4 }
   0xf   :  { %p1219_p7 = pnand %p1218_p6, %p1212_p3 }
  0x11   :  { %1222 = shalt.err (!%p1219_p7)
}
  0x12   :  { %19 = dma.hbm_to_vmem [thread:$0]  %s1364_s0, 128, %s17_s10, [#allocation3]  }
  0x13   :  { %s1223_s25 = scalar_lea.hbm %s1365_s1, 2048 }
  0x14   :  { %p1224_p8 = scmp.ne.s32.totalorder %s1365_s1, %s1223_s25  ;;  %p1227_p9 = scmp.lt.u32.totalorder %s1223_s25, %s1365_s1 }
  0x16   :  { %p1229_p10 = pnand %p1227_p9, %p1224_p8 }
  0x18   :  { %1232 = shalt.err (!%p1229_p10)
}
  0x19   :  { %s1233_s30 = scalar_lea.vmem %s1298_s12, 2048  ;;  %p1238_p12 = scmp.lt.s32.totalorder %s1298_s12, %s1298_s12 }
  0x1a   :  { %p1234_p11 = scmp.ne.s32.totalorder %s1298_s12, %s1233_s30  ;;  %p1239_p13 = scmp.lt.s32.totalorder %s1233_s30, %s1233_s30 }
  0x1c   :  { %p1240_p0 = por %p1239_p13, %p1238_p12 }
  0x1e   :  { %p1241_p1 = pnand %p1240_p0, %p1234_p11 }
  0x20   :  { %1244 = shalt.err (!%p1241_p1)
}
  0x21   :  { %s1275_s0 = smov 128   ;;  %s1276_s3 = smov 8  }
  0x22   :  { %31 = dma.hbm_to_vmem [thread:$0]  %s1365_s1, 2048, %s1298_s12, [#allocation6], %s1275_s0, %s1275_s0, %s1276_s3  }
  0x23   :  { %1267 = dma.done.wait [#allocation3], 128  }
  0x24   :  { %1268 = vsyncadd [#allocation3], 4294967168 }
  0x25   :  { %1269 = dma.done.wait [#allocation6], 2048  }
  0x26   :  { %1270 = vsyncadd [#allocation6], 4294965248  ;;  %v38_v0 = vld [vmem:[#allocation2] sm:$0xff]  ;;  %s1277_s6 = smov 96   ;;  %s1278_s7 = smov 32   ;;  %v49_v1 = vld [vmem:[#allocation5] sm:$0xff] }
  0x27   :  { %40 = vrot.lane.b32.xlu0 %v38_v0, %s1277_s6  ;;  %46 = vrot.lane.b32.xlu1 %v38_v0, %s1278_s7  ;;  %s1279_s8 = smov 64   ;;  %v50_v2 = vld [vmem:[#allocation5 + $0x8] sm:$0xff]  ;;  %v53_v3 = vld [vmem:[#allocation5 + $0x20] sm:$0xff]  ;;  %v51_v4 = vld [vmem:[#allocation5 + $0x10] sm:$0xff]  ;;  %vm225_vm0 = vcmask 261120   ;;  %vm987_vm1 = vcmask 523264  }
  0x28   :  { %v54_v5 = vld [vmem:[#allocation5 + $0x28] sm:$0xff]  ;;  %v52_v6 = vld [vmem:[#allocation5 + $0x18] sm:$0xff]  ;;  %v55_v7 = vld [vmem:[#allocation5 + $0x30] sm:$0xff]  ;;  %s1282_s1 = smov [#allocation7]   ;;  %vm989_vm2 = vcmask 785408  }
  0x29   :  { %v56_v8 = vld [vmem:[#allocation5 + $0x38] sm:$0xff]  ;;  %v61_v14 = vld [vmem:[#allocation5 + $0x60] sm:$0xff]  ;;  %v62_v16 = vld [vmem:[#allocation5 + $0x68] sm:$0xff]  ;;  %s998_s9 = sshll.u32 %s1282_s1, 4  ;;  %s999_s9 = int_to_ptr.vmem [resolvable:$true] %s998_s9 }
  0x2a   :  { %v57_v15 = vld [vmem:[#allocation5 + $0x40] sm:$0xff]  ;;  %v58_v17 = vld [vmem:[#allocation5 + $0x48] sm:$0xff]  ;;  %v63_v18 = vld [vmem:[#allocation5 + $0x70] sm:$0xff]  ;;  %s1245_s10 = scalar_lea.vmem %s999_s9, 128  ;;  %p1250_p3 = scmp.lt.s32.totalorder %s999_s9, %s999_s9 }
  0x2b   :  { %43 = vrot.lane.b32.xlu0 %v38_v0, %s1279_s8  ;;  %v59_v19 = vld [vmem:[#allocation5 + $0x50] sm:$0xff]  ;;  %v64_v20 = vld [vmem:[#allocation5 + $0x78] sm:$0xff]  ;;  %p1246_p2 = scmp.ne.s32.totalorder %s999_s9, %s1245_s10  ;;  %p1251_p4 = scmp.lt.s32.totalorder %s1245_s10, %s1245_s10 }
  0x2c   :  { %v60_v21 = vld [vmem:[#allocation5 + $0x58] sm:$0xff] }
  0x2d   :  { %p1252_p5 = por %p1251_p4, %p1250_p3 }
  0x2f   :  { %p1253_p6 = pnand %p1252_p5, %p1246_p2 }
  0x49   :  { %193 = vxpose.xlu0.b32.start [1/4] (short) (narrow) %v49_v1, 32 }
  0x4d   :  { %194 = vxpose.xlu0.b32.cont [2/4] (short) (narrow) %v50_v2, 32 }
  0x50   :  { %323 = vxpose.xlu1.b32.start [1/4] (short) (narrow) %v53_v3, 32 }
  0x51   :  { %195 = vxpose.xlu0.b32.cont [3/4] (short) (narrow) %v51_v4, 32 }
  0x54   :  { %324 = vxpose.xlu1.b32.cont [2/4] (short) (narrow) %v54_v5, 32 }
  0x55   :  { %196 = vxpose.xlu0.b32.end [4/4] (short) (narrow) %v52_v6, 32 }
  0x58   :  { %325 = vxpose.xlu1.b32.cont [3/4] (short) (narrow) %v55_v7, 32 }
  0x5c   :  { %326 = vxpose.xlu1.b32.end [4/4] (short) (narrow) %v56_v8, 32 }
  0x99   :  { %v41_v9 = vpop.permute.xlu0 %40  ;;  %v47_v11 = vpop.permute.xlu1 %46 }
  0x9a   :  { %v1157_v10 = vpack.i.bf16 %v41_v9, %v38_v0 }
  0x9c   :  { %1158 = vxpose.xlu1.b32.start.end [1/1] (short) (narrow) %v1157_v10, 32 }
  0x9d   :  { %v44_v12 = vpop.permute.xlu0 %43 }
  0x9e   :  { %v1179_v13 = vpack.i.bf16 %v47_v11, %v44_v12 }
  0xa0   :  { %1180 = vxpose.xlu0.b32.start.end [1/1] (short) (narrow) %v1179_v13, 32 }
  0xa9   :  { %581 = vxpose.xlu1.b32.start [1/4] (short) (narrow) %v61_v14, 32 }
  0xad   :  { %452 = vxpose.xlu0.b32.start [1/4] (short) (narrow) %v57_v15, 32  ;;  %582 = vxpose.xlu1.b32.cont [2/4] (short) (narrow) %v62_v16, 32 }
  0xb1   :  { %453 = vxpose.xlu0.b32.cont [2/4] (short) (narrow) %v58_v17, 32  ;;  %583 = vxpose.xlu1.b32.cont [3/4] (short) (narrow) %v63_v18, 32 }
  0xb5   :  { %454 = vxpose.xlu0.b32.cont [3/4] (short) (narrow) %v59_v19, 32  ;;  %584 = vxpose.xlu1.b32.end [4/4] (short) (narrow) %v64_v20, 32 }
  0xb9   :  { %455 = vxpose.xlu0.b32.end [4/4] (short) (narrow) %v60_v21, 32 }
  0xc9   :  { %v209_v22 = vpop.trf.xlu0 }
  0xca   :  { %1066 = vmatprep.mubr.msk.f32.mxu0 %vm225_vm0, %v209_v22  ;;  %v1280_v22 = vmov 1983009808  }
  0xcd   :  { %v210_v25 = vpop.trf.xlu0 }
  0xd0   :  { %v339_v23 = vpop.trf.xlu1 }
  0xd1   :  { %1080 = vmatprep.mubr.msk.f32.mxu1 %vm225_vm0, %v339_v23  ;;  %v211_v27 = vpop.trf.xlu0  ;;  %v841_v23 = vunpack.c.l.s4 %v1280_v22 }
  0xd4   :  { %v340_v24 = vpop.trf.xlu1 }
  0xd5   :  { %v212_v29 = vpop.trf.xlu0 }
  0xd8   :  { %v341_v26 = vpop.trf.xlu1 }
  0xdc   :  { %v342_v28 = vpop.trf.xlu1 }
 0x11c   :  { %v1159_v30 = vpop.trf.xlu1 }
 0x11d   :  { %v1160_v32 = vunpack.i.l.bf16 %v1159_v30  ;;  %v1163_v33 = vunpack.i.h.bf16 %v1159_v30 }
 0x120   :  { %v1164_v31 = vpop.trf.xlu1  ;;  %v1181_v34 = vpop.trf.xlu0 }
 0x121   :  { %v1165_v35 = vunpack.i.l.bf16 %v1164_v31  ;;  %v1168_v36 = vunpack.i.h.bf16 %v1164_v31  ;;  %v1185_v41 = vunpack.i.h.bf16 %v1181_v34  ;;  %v1182_v42 = vunpack.i.l.bf16 %v1181_v34 }
 0x123   :  { %v1114_v37 = vpack.c.bf16 %v1165_v35, %v1160_v32  ;;  %v1122_v38 = vpack.c.bf16 %v1168_v36, %v1163_v33 }
 0x124   :  { %v1169_v39 = vpop.trf.xlu1  ;;  %v1186_v40 = vpop.trf.xlu0 }
 0x125   :  { %1115 = vmatprep.subr.bf16.mxu0 %v1114_v37  ;;  %1123 = vmatprep.subr.bf16.mxu1 %v1122_v38  ;;  %v1190_v43 = vunpack.i.h.bf16 %v1186_v40  ;;  %v1187_v44 = vunpack.i.l.bf16 %v1186_v40  ;;  %v1173_v45 = vunpack.i.h.bf16 %v1169_v39  ;;  %v1170_v46 = vunpack.i.l.bf16 %v1169_v39 }
 0x126   :  { %1117 = vmatpush3.bf16.msra.mxu0 %v1114_v37  ;;  %1125 = vmatpush3.bf16.msra.mxu1 %v1122_v38 }
 0x127   :  { %v1130_v53 = vpack.c.bf16 %v1187_v44, %v1182_v42  ;;  %v1138_v54 = vpack.c.bf16 %v1190_v43, %v1185_v41 }
 0x128   :  { %v1174_v47 = vpop.trf.xlu1  ;;  %v1191_v48 = vpop.trf.xlu0 }
 0x129   :  { %v1178_v49 = vunpack.i.h.bf16 %v1174_v47  ;;  %v1175_v50 = vunpack.i.l.bf16 %v1174_v47  ;;  %v1195_v55 = vunpack.i.h.bf16 %v1191_v48  ;;  %v1192_v56 = vunpack.i.l.bf16 %v1191_v48 }
 0x12b   :  { %v1118_v51 = vpack.c.bf16 %v1175_v50, %v1170_v46  ;;  %v1126_v52 = vpack.c.bf16 %v1178_v49, %v1173_v45 }
 0x12c   :  { %v1196_v57 = vpop.trf.xlu0  ;;  %v597_v58 = vpop.trf.xlu1 }
 0x12d   :  { %1119 = vmatprep.subr.bf16.mxu0 %v1118_v51  ;;  %1127 = vmatprep.subr.bf16.mxu1 %v1126_v52  ;;  %v1200_v59 = vunpack.i.h.bf16 %v1196_v57  ;;  %v1197_v60 = vunpack.i.l.bf16 %v1196_v57 }
 0x12e   :  { %1121 = vmatpush3.bf16.msra.mxu0 %v1118_v51  ;;  %1129 = vmatpush3.bf16.msra.mxu1 %v1126_v52 }
 0x12f   :  { %1131 = vmatprep.subr.bf16.mxu0 %v1130_v53  ;;  %1139 = vmatprep.subr.bf16.mxu1 %v1138_v54  ;;  %v1134_v61 = vpack.c.bf16 %v1197_v60, %v1192_v56  ;;  %v1142_v62 = vpack.c.bf16 %v1200_v59, %v1195_v55 }
 0x130   :  { %v468_v63 = vpop.trf.xlu0  ;;  %v598_v0 = vpop.trf.xlu1 }
 0x131   :  { %1067 = vmatmul.mubr.msk.f32.vlgmr.msra.gmra.mrb[0].mxu0 %vm225_vm0, %v210_v25  ;;  %1081 = vmatmul.mubr.msk.f32.vlgmr.msra.gmra.mrb[0].mxu1 %vm225_vm0, %v340_v24  ;;  %v843_v24 = vlaneseq }
 0x132   :  { %1069 = vmatprep.mubr.msk.f32.mxu0 %vm225_vm0, %v211_v27  ;;  %1083 = vmatprep.mubr.msk.f32.mxu1 %vm225_vm0, %v341_v26  ;;  %v1281_v27 = vmov 1934713408  }
 0x133   :  { %1133 = vmatpush3.bf16.msra.mxu0 %v1130_v53  ;;  %1141 = vmatpush3.bf16.msra.mxu1 %v1138_v54  ;;  %v844_v30 = vshrl.u32 %v843_v24, 7 }
 0x134   :  { %1135 = vmatprep.subr.bf16.mxu0 %v1134_v61  ;;  %1143 = vmatprep.subr.bf16.mxu1 %v1142_v62  ;;  %v469_v1 = vpop.trf.xlu0  ;;  %v599_v2 = vpop.trf.xlu1 }
 0x135   :  { %1070 = vmatmul.mubr.msk.f32.gmra.mrb[2].mxu0 %vm225_vm0, %v212_v29  ;;  %1084 = vmatmul.mubr.msk.f32.gmra.mrb[2].mxu1 %vm225_vm0, %v342_v28  ;;  %v873_v28 = vunpack.c.l.s4 %v1281_v27  ;;  %v842_v29 = vunpack.c.0.s8 %v841_v23 }
 0x136   :  { %1094 = vmatprep.mubr.msk.f32.mxu0 %vm225_vm0, %v468_v63  ;;  %1108 = vmatprep.mubr.msk.f32.mxu1 %vm225_vm0, %v597_v58 }
 0x137   :  { %1137 = vmatpush3.bf16.msra.mxu0 %v1134_v61  ;;  %1145 = vmatpush3.bf16.msra.mxu1 %v1142_v62  ;;  %v874_v31 = vunpack.c.0.s8 %v873_v28  ;;  %v845_v32 = vsub.s32 %v842_v29, %v844_v30 }
 0x138   :  { %v470_v3 = vpop.trf.xlu0  ;;  %v600_v4 = vpop.trf.xlu1 }
 0x139   :  { %v877_v39 = vsub.s32 %v874_v31, %v844_v30 }
 0x13a   :  { %1095 = vmatmul.mubr.msk.f32.vlgmr.msra.gmra.mrb[4].mxu0 %vm225_vm0, %v469_v1  ;;  %1109 = vmatmul.mubr.msk.f32.vlgmr.msra.gmra.mrb[4].mxu1 %vm225_vm0, %v598_v0 }
 0x13b   :  { %1097 = vmatprep.mubr.msk.f32.mxu0 %vm225_vm0, %v470_v3  ;;  %1111 = vmatprep.mubr.msk.f32.mxu1 %vm225_vm0, %v599_v2 }
 0x13c   :  { %v471_v5 = vpop.trf.xlu0 }
 0x13e   :  { %1098 = vmatmul.mubr.msk.f32.gmra.mrb[6].mxu0 %vm225_vm0, %v471_v5  ;;  %1112 = vmatmul.mubr.msk.f32.gmra.mrb[6].mxu1 %vm225_vm0, %v600_v4 }
 0x204   :  { %v1068_v6 = vpop.f32.mrb[0].mxu0  ;;  %v1082_v7 = vpop.f32.mrb[0].mxu1 }
 0x205   :  { %v304_v8 = vpop.f32.mrb[1].mxu0  ;;  %v433_v9 = vpop.f32.mrb[1].mxu1 }
 0x206   :  { %742 = vxpose.xlu1.b32.start [1/4] (short) (narrow) %v433_v9, 8  ;;  %710 = vxpose.xlu0.b32.start [1/4] (short) (narrow) %v304_v8, 8 }
 0x208   :  { %v1071_v10 = vpop.f32.mrb[2].mxu0  ;;  %v1085_v11 = vpop.f32.mrb[2].mxu1 }
 0x209   :  { %v314_v12 = vpop.f32.mrb[3].mxu0  ;;  %v443_v13 = vpop.f32.mrb[3].mxu1 }
 0x20a   :  { %743 = vxpose.xlu1.b32.cont [2/4] (short) (narrow) %v1082_v7, 8  ;;  %711 = vxpose.xlu0.b32.cont [2/4] (short) (narrow) %v1068_v6, 8 }
 0x20d   :  { %v1096_v14 = vpop.f32.mrb[4].mxu0  ;;  %v1110_v15 = vpop.f32.mrb[4].mxu1 }
 0x20e   :  { %744 = vxpose.xlu1.b32.cont [3/4] (short) (narrow) %v443_v13, 8  ;;  %712 = vxpose.xlu0.b32.cont [3/4] (short) (narrow) %v314_v12, 8  ;;  %v562_v16 = vpop.f32.mrb[5].mxu0  ;;  %v691_v17 = vpop.f32.mrb[5].mxu1 }
 0x211   :  { %v1099_v18 = vpop.f32.mrb[6].mxu0  ;;  %v1113_v19 = vpop.f32.mrb[6].mxu1 }
 0x212   :  { %745 = vxpose.xlu1.b32.end [4/4] (short) (narrow) %v1085_v11, 8  ;;  %713 = vxpose.xlu0.b32.end [4/4] (short) (narrow) %v1071_v10, 8  ;;  %v572_v20 = vpop.f32.mrb[7].mxu0  ;;  %v701_v21 = vpop.f32.mrb[7].mxu1 }
 0x216   :  { %806 = vxpose.xlu1.b32.start [1/4] (short) (narrow) %v691_v17, 8  ;;  %774 = vxpose.xlu0.b32.start [1/4] (short) (narrow) %v562_v16, 8 }
 0x21a   :  { %807 = vxpose.xlu1.b32.cont [2/4] (short) (narrow) %v1110_v15, 8  ;;  %775 = vxpose.xlu0.b32.cont [2/4] (short) (narrow) %v1096_v14, 8 }
 0x21e   :  { %808 = vxpose.xlu1.b32.cont [3/4] (short) (narrow) %v701_v21, 8  ;;  %776 = vxpose.xlu0.b32.cont [3/4] (short) (narrow) %v572_v20, 8 }
 0x222   :  { %809 = vxpose.xlu1.b32.end [4/4] (short) (narrow) %v1113_v19, 8  ;;  %777 = vxpose.xlu0.b32.end [4/4] (short) (narrow) %v1099_v18, 8 }
 0x286   :  { %v758_v25 = vpop.trf.xlu1  ;;  %v726_v26 = vpop.trf.xlu0 }
 0x296   :  { %v822_v33 = vpop.trf.xlu1  ;;  %v790_v34 = vpop.trf.xlu0 }
 0x297   :  { %v854_v35 = vcombine.low %v758_v25, %v822_v33  ;;  %v855_v36 = vcombine.high %v758_v25, %v822_v33  ;;  %v838_v37 = vcombine.low %v726_v26, %v790_v34  ;;  %v839_v38 = vcombine.high %v726_v26, %v790_v34 }
 0x299   :  { %v862_v40 = vrot.slane %v854_v35, %v845_v32  ;;  %v869_v41 = vrot.slane %v855_v36, %v845_v32  ;;  %v846_v42 = vrot.slane %v838_v37, %v845_v32  ;;  %v853_v43 = vrot.slane %v839_v38, %v845_v32 }
 0x29b   :  { %v870_v44 = vcombine.low %v846_v42, %v862_v40  ;;  %v871_v45 = vcombine.high %v846_v42, %v862_v40  ;;  %v886_v46 = vcombine.low %v853_v43, %v869_v41  ;;  %v887_v47 = vcombine.high %v853_v43, %v869_v41 }
 0x29d   :  { %v878_v48 = vrot.slane %v870_v44, %v877_v39  ;;  %v885_v49 = vrot.slane %v871_v45, %v877_v39  ;;  %v894_v50 = vrot.slane %v886_v46, %v877_v39  ;;  %v901_v51 = vrot.slane %v887_v47, %v877_v39 }
 0x29f   :  { %v906_v52 = vcombine.low %v878_v48, %v885_v49  ;;  %v1024_v53 = vcombine.high %v878_v48, %v885_v49  ;;  %v922_v54 = vcombine.low %v894_v50, %v901_v51  ;;  %v1025_v55 = vcombine.high %v894_v50, %v901_v51 }
 0x2a1   :  { %v913_v56 = vrot.slane %v906_v52, %v845_v32  ;;  %v921_v57 = vrot.slane %v1024_v53, %v845_v32  ;;  %v929_v58 = vrot.slane %v922_v54, %v845_v32  ;;  %v937_v59 = vrot.slane %v1025_v55, %v845_v32 }
 0x2a3   :  { %v939_v60 = vcombine.high %v913_v56, %v921_v57  ;;  %v955_v61 = vcombine.high %v929_v58, %v937_v59  ;;  %v938_v62 = vcombine.low %v913_v56, %v921_v57  ;;  %v954_v63 = vcombine.low %v929_v58, %v937_v59 }
 0x2a5   :  { %v953_v0 = vrot.slane %v939_v60, %v877_v39  ;;  %v969_v1 = vrot.slane %v955_v61, %v877_v39  ;;  %v946_v2 = vrot.slane %v938_v62, %v877_v39  ;;  %v962_v3 = vrot.slane %v954_v63, %v877_v39 }
 0x2a7   :  { %v972_v4 = vcombine.low %v953_v0, %v969_v1  ;;  %v971_v5 = vcombine.high %v946_v2, %v962_v3  ;;  %v970_v6 = vcombine.low %v946_v2, %v962_v3  ;;  %v973_v7 = vcombine.high %v953_v0, %v969_v1 }
 0x2a9   :  { %979 = vrot.lane.b32.xlu1 %v972_v4, %s1279_s8  ;;  %975 = vrot.lane.b32.xlu0 %v971_v5, %s1278_s7 }
 0x2ad   :  { %983 = vrot.lane.b32.xlu1 %v973_v7, %s1277_s6 }
 0x31b   :  { %v980_v8 = vpop.permute.xlu1 %979  ;;  %v976_v9 = vpop.permute.xlu0 %975 }
 0x31c   :  { %v986_v10 = vsel %vm225_vm0, %v970_v6, %v976_v9 }
 0x31d   :  { %v988_v12 = vsel %vm987_vm1, %v986_v10, %v980_v8 }
 0x31f   :  { %v984_v11 = vpop.permute.xlu1 %983 }
 0x320   :  { %v990_v13 = vsel %vm989_vm2, %v988_v12, %v984_v11 }
 0x321   :  { %991 = vst [vmem:[#allocation7] sm:$0xff] %v990_v13 }
 0x322   :  { %1256 = shalt.err (!%p1253_p6)
}
 0x323   :  { %s1257_s13 = scalar_lea.hbm %s1366_s2, 128 }
 0x324   :  { %p1258_p7 = scmp.ne.s32.totalorder %s1366_s2, %s1257_s13  ;;  %p1261_p8 = scmp.lt.u32.totalorder %s1257_s13, %s1366_s2 }
 0x326   :  { %p1263_p9 = pnand %p1261_p8, %p1258_p7 }
 0x328   :  { %1266 = shalt.err (!%p1263_p9)
}
 0x329   :  { %1001 = dma.vmem_to_hbm [thread:$0]  %s999_s9, 128, %s1366_s2, [#allocation4]  }
 0x32a   :  { %1271 = dma.done.wait [#allocation4], 128  }
 0x32b   :  { %1272 = vsyncadd [#allocation4], 4294967168 }
 0x32c   :  { %1005 = vsyncpa [#allocation3], 1 }
 0x32d   :  { %1006 = vsyncpa [#allocation6], 1 }
 0x32e   :  { %1007 = vsyncpa [#allocation4], 1 }

</bundles_post_ra>
